<compile_context>
chip_gen: v5e
topology: v5e:2x2
jax: 0.10.0
libtpu: 0.0.40
codegen_flags: <defaults>
</compile_context>

<pallas_src>
import functools

import jax
import jax.numpy as jnp
from jax import lax
from jax.experimental import pallas as pl
from jax.experimental.pallas import tpu as pltpu


def _round_up(x, m):
    return ((x + m - 1) // m) * m


_VMEM_CAP = 40 * 1024 * 1024  # keep well under v7x's 64 MiB/TC; fine on v5e/v6e too


def _vmem_limit(working_set_bytes):
    # Actual double-buffered working set + headroom, floored at the v5e default.
    return int(min(_VMEM_CAP, max(16 << 20, working_set_bytes + (8 << 20))))


# ----------------------------------------------------------------------------
# Linear forward kernels (x[M,K] @ Wt[K,N] + b)
# ----------------------------------------------------------------------------
def _linear_kernel_single_k(x_ref, wt_ref, b_ref, o_ref):
    # Whole K in one tile: no accumulator scratch, single MXU pass + bias + store.
    acc = jnp.dot(x_ref[...], wt_ref[...],
                  preferred_element_type=jnp.float32,
                  precision=lax.Precision.HIGHEST)
    o_ref[...] = (acc + b_ref[...].astype(jnp.float32)).astype(o_ref.dtype)


def _linear_kernel_multi_k(x_ref, wt_ref, b_ref, o_ref, acc_ref):
    k = pl.program_id(2)

    @pl.when(k == 0)
    def _():
        acc_ref[...] = jnp.zeros_like(acc_ref)

    acc_ref[...] += jnp.dot(x_ref[...], wt_ref[...],
                            preferred_element_type=jnp.float32,
                            precision=lax.Precision.HIGHEST)

    @pl.when(k == pl.num_programs(2) - 1)
    def _():
        o_ref[...] = (acc_ref[...] + b_ref[...].astype(jnp.float32)).astype(o_ref.dtype)


def _prepare_linear_weights(w, b, compute_dtype=None):
    """One-time prep (cached by the model): transpose W to [K, N], pad to tile
    multiples, pick tn/tk.  Done once per weight update, not per forward."""
    n_out, k_in = w.shape
    cdtype = jnp.dtype(compute_dtype) if compute_dtype is not None else w.dtype
    tn = min(512, _round_up(n_out, 128))
    k128 = _round_up(k_in, 128)
    tk = k128 if k128 <= 2048 else 1024          # tk = K entirely when affordable
    np_ = _round_up(n_out, tn)
    kp_ = _round_up(k128, tk)
    w_t_p = jnp.pad(w.T.astype(cdtype), ((0, kp_ - k_in), (0, np_ - n_out)))
    b_p = jnp.pad(b.astype(jnp.float32), (0, np_ - n_out)).reshape(1, np_)
    return {"w_t": w_t_p, "b": b_p, "tk": tk, "tn": tn, "n_out": n_out,
            "src_w": w, "src_b": b}


@functools.partial(jax.jit, static_argnames=("tk", "tn", "n_out"))
def _linear_forward_2d(x2d, w_t_p, b_p, *, tk, tn, n_out):
    m, k_in = x2d.shape
    kp_, np_ = w_t_p.shape
    out_dtype = x2d.dtype
    in_dtype = w_t_p.dtype
    x2d = x2d.astype(in_dtype)

    tm = min(512, _round_up(m, 8))
    mp_ = _round_up(m, tm)
    gm, gn, gk = mp_ // tm, np_ // tn, kp_ // tk
    # v7x has 2 TensorCores: keep >= 2 parallel grid points when possible so both
    # cores get work (neutral on v5e/v6e).
    if gm == 1 and gn == 1 and m >= 16:
        tm = _round_up(-(-m // 2), 8)
        mp_ = _round_up(m, tm)
        gm = mp_ // tm

    # Only x is padded per call (K-padding contributes zeros to the dot).
    x_p = jnp.pad(x2d, ((0, mp_ - m), (0, kp_ - k_in)))

    ib = jnp.dtype(in_dtype).itemsize
    ob = jnp.dtype(out_dtype).itemsize
    wset = 2 * (tm * tk + tk * tn) * ib + 2 * tm * tn * ob + 2 * tn * 4
    if gk > 1:
        wset += tm * tn * 4

    if gk > 1:
        params = pltpu.CompilerParams(
            dimension_semantics=("parallel", "parallel", "arbitrary"),
            vmem_limit_bytes=_vmem_limit(wset))
        out_p = pl.pallas_call(
            _linear_kernel_multi_k,
            out_shape=jax.ShapeDtypeStruct((mp_, np_), out_dtype),
            grid_spec=pltpu.PrefetchScalarGridSpec(
                num_scalar_prefetch=0,
                grid=(gm, gn, gk),
                in_specs=[
                    pl.BlockSpec((tm, tk), lambda i, j, k: (i, k)),   # x tile
                    pl.BlockSpec((tk, tn), lambda i, j, k: (k, j)),   # W^T tile [K,N]
                    pl.BlockSpec((1, tn), lambda i, j, k: (0, j)),    # bias tile
                ],
                out_specs=pl.BlockSpec((tm, tn), lambda i, j, k: (i, j)),
                scratch_shapes=[pltpu.VMEM((tm, tn), jnp.float32)],
            ),
            compiler_params=params,
        )(x_p, w_t_p, b_p)
    else:
        params = pltpu.CompilerParams(
            dimension_semantics=("parallel", "parallel"),
            vmem_limit_bytes=_vmem_limit(wset))
        out_p = pl.pallas_call(
            _linear_kernel_single_k,
            out_shape=jax.ShapeDtypeStruct((mp_, np_), out_dtype),
            grid_spec=pltpu.PrefetchScalarGridSpec(
                num_scalar_prefetch=0,
                grid=(gm, gn),
                in_specs=[
                    pl.BlockSpec((tm, tk), lambda i, j: (i, 0)),
                    pl.BlockSpec((tk, tn), lambda i, j: (0, j)),
                    pl.BlockSpec((1, tn), lambda i, j: (0, j)),
                ],
                out_specs=pl.BlockSpec((tm, tn), lambda i, j: (i, j)),
            ),
            compiler_params=params,
        )(x_p, w_t_p, b_p)
    return out_p[:m, :n_out]


# ----------------------------------------------------------------------------
# EMA parameter blend: one pallas_call per leaf, native dtype, in-place alias
# ----------------------------------------------------------------------------
def _ema_blend_kernel(decay_ref, ema_ref, p_ref, o_ref):
    # ema_new = ema + (1 - d) * (p - ema) == d*ema + (1-d)*p  (blend in f32,
    # loads/stores stay in the leaf's native dtype -> no extra HBM traffic).
    d = decay_ref[0]
    ema = ema_ref[...].astype(jnp.float32)
    p = p_ref[...].astype(jnp.float32)
    o_ref[...] = (ema + (1.0 - d) * (p - ema)).astype(o_ref.dtype)


_EMA_MAX_BLOCK_BYTES = 2 << 20  # ~2 MiB blocks sit near the HBM roofline knee


@functools.partial(jax.jit, donate_argnums=(0,))
def _ema_blend_leaf(ema_leaf, p_leaf, decay_arr):
    shape, dtype = ema_leaf.shape, ema_leaf.dtype
    size = ema_leaf.size
    if ema_leaf.ndim >= 2:
        last = shape[-1]
        rows = size // last
    elif size >= 1024 and size % 128 == 0:
        last = 1024 if size % 1024 == 0 else 128
        rows = size // last
    else:
        last = max(size, 1)
        rows = 1
    e2 = ema_leaf.reshape(rows, last)
    p2 = p_leaf.reshape(rows, last).astype(dtype)

    itemsize = jnp.dtype(dtype).itemsize
    total_bytes = rows * last * itemsize
    if rows % 8 != 0 or total_bytes <= _EMA_MAX_BLOCK_BYTES:
        br = rows                                # full-array block (always legal)
    else:
        br = 8
        for cand in (1024, 512, 256, 128, 64, 32, 16, 8):
            if rows % cand == 0 and cand * last * itemsize <= _EMA_MAX_BLOCK_BYTES:
                br = cand
                break
    grid = (rows // br,)
    wset = 3 * 2 * br * last * itemsize          # 3 refs, double-buffered

    out2 = pl.pallas_call(
        _ema_blend_kernel,
        out_shape=jax.ShapeDtypeStruct((rows, last), dtype),
        grid_spec=pltpu.PrefetchScalarGridSpec(
            num_scalar_prefetch=0,
            grid=grid,
            in_specs=[
                pl.BlockSpec(memory_space=pltpu.MemorySpace.SMEM),   # decay scalar
                pl.BlockSpec((br, last), lambda i: (i, 0)),          # ema leaf tile
                pl.BlockSpec((br, last), lambda i: (i, 0)),          # param leaf tile
            ],
            out_specs=pl.BlockSpec((br, last), lambda i: (i, 0)),
        ),
        input_output_aliases={1: 0},             # EMA leaf is updated in place
        compiler_params=pltpu.CompilerParams(
            dimension_semantics=("parallel",),
            vmem_limit_bytes=_vmem_limit(wset),
        ),
    )(decay_arr, e2, p2)
    return out2.reshape(shape)


# ----------------------------------------------------------------------------
# ModelWithEMA in JAX/Pallas
# ----------------------------------------------------------------------------
class ModelWithEMA:
    def __init__(self, params, ema=True, ema_decay=0.999, compute_dtype=None):
        self.params = dict(params)               # base model parameters
        self.ema = ema
        self.ema_decay = float(ema_decay)
        self.compute_dtype = compute_dtype       # e.g. jnp.bfloat16 for MXU speed
        self.training = True
        self._prep_cache = {}                    # prepared (transposed+padded) weights
        if ema:
            # AveragedModel starts as an independent copy of the base model.
            self.ema_params = {k: jnp.array(v) for k, v in self.params.items()}
            self.n_averaged = 0

    def train(self):
        self.training = True
        return self

    def eval(self):
        self.training = False
        return self

    def _prepared(self, which):
        p = self.params if which == "base" else self.ema_params
        w, b = p["weight"], p["bias"]
        cache = self._prep_cache.get(which)
        if cache is None or cache["src_w"] is not w or cache["src_b"] is not b:
            cache = _prepare_linear_weights(w, b, self.compute_dtype)
            self._prep_cache[which] = cache
        return cache

    def update_ema_parameters(self):
        if not self.ema:
            return
        if self.n_averaged == 0:
            # First update_parameters() call copies the base params (independent copy
            # so the donated/aliased EMA buffers never overlap the base params).
            self.ema_params = {k: jnp.array(v) for k, v in self.params.items()}
        else:
            decay_arr = jnp.asarray(self.ema_decay, dtype=jnp.float32).reshape((1,))
            self.ema_params = {
                k: _ema_blend_leaf(self.ema_params[k], self.params[k], decay_arr)
                for k in self.ema_params
            }
        self.n_averaged += 1

    def __call__(self, x):
        which = "base" if (not self.ema or self.training) else "ema"
        prep = self._prepared(which)
        b, s, h_in = x.shape
        out2d = _linear_forward_2d(
            x.reshape(b * s, h_in), prep["w_t"], prep["b"],
            tk=prep["tk"], tn=prep["tn"], n_out=prep["n_out"])
        return out2d.reshape(b, s, prep["n_out"])


# ----------------------------------------------------------------------------
# Demo / smoke test
# ----------------------------------------------------------------------------
if __name__ == "__main__":
    key = jax.random.PRNGKey(0)
    k_x, k_w, k_b, k_w2 = jax.random.split(key, 4)

    B, S, H = 2, 8, 32
    x = jax.random.normal(k_x, (B, S, H), dtype=jnp.float32)
    params = {
        "weight": jax.random.normal(k_w, (H, H), dtype=jnp.float32) * 0.1,
        "bias": jax.random.normal(k_b, (H,), dtype=jnp.float32) * 0.1,
    }

    model = ModelWithEMA(params, ema=True, ema_decay=0.999)

    # --- training-mode forward (uses base model) ---
    model.train()
    y_train = model(x)
    jax.block_until_ready(y_train)
    y_ref = jnp.einsum("bsh,oh->bso", x, params["weight"],
                       precision="highest") + params["bias"]
    assert jnp.allclose(y_train, y_ref, atol=1e-4), "training forward mismatch"

    # --- EMA updates: first copies, later ones blend via the Pallas kernel ---
    model.update_ema_parameters()                 # copy (n_averaged == 0)
    # simulate a training step changing the base params
    model.params["weight"] = model.params["weight"] + 0.05 * jax.random.normal(
        k_w2, (H, H), dtype=jnp.float32)
    model.params["bias"] = model.params["bias"] + 0.01
    model.update_ema_parameters()                 # EMA blend (Pallas kernel, in place)
    jax.block_until_ready(model.ema_params["weight"])

    ema_w_ref = 0.999 * params["weight"] + 0.001 * model.params["weight"]
    ema_b_ref = 0.999 * params["bias"] + 0.001 * model.params["bias"]
    assert jnp.allclose(model.ema_params["weight"], ema_w_ref, atol=1e-5), "EMA weight mismatch"
    assert jnp.allclose(model.ema_params["bias"], ema_b_ref, atol=1e-5), "EMA bias mismatch"

    # --- eval-mode forward (uses EMA model) ---
    model.eval()
    y_eval = model(x)
    jax.block_until_ready(y_eval)
    y_eval_ref = jnp.einsum("bsh,oh->bso", x, model.ema_params["weight"],
                            precision="highest") + model.ema_params["bias"]
    assert jnp.allclose(y_eval, y_eval_ref, atol=1e-4), "eval (EMA) forward mismatch"

    print("KERNEL_OK")
</pallas_src>

<mosaic_0001>
module attributes {stable_mosaic.version = 11 : i64} {
  func.func @_linear_kernel_single_k(%arg0: i32, %arg1: i32, %arg2: memref<8x128xf32, #tpu.memory_space<vmem>>, %arg3: memref<128x128xf32, #tpu.memory_space<vmem>>, %arg4: memref<1x128xf32, #tpu.memory_space<vmem>>, %arg5: memref<8x128xf32, #tpu.memory_space<vmem>>) attributes {dimension_semantics = [#tpu.dimension_semantics<parallel>, #tpu.dimension_semantics<parallel>], iteration_bounds = array<i64: 2, 1>, scalar_prefetch = 0 : i64, scratch_operands = 0 : i64, tpu.core_type = #tpu.core_type<tc>, window_params = [{transform_indices = @transform_0, window_bounds = array<i64: 8, 128>}, {transform_indices = @transform_1, window_bounds = array<i64: 128, 128>}, {transform_indices = @transform_2, window_bounds = array<i64: 1, 128>}, {transform_indices = @transform_3, window_bounds = array<i64: 8, 128>}]} {
    %c0 = arith.constant 0 : index
    %c0_0 = arith.constant 0 : index
    %0 = vector.load %arg2[%c0, %c0_0] : memref<8x128xf32, #tpu.memory_space<vmem>>, vector<8x128xf32>
    %c0_1 = arith.constant 0 : index
    %c0_2 = arith.constant 0 : index
    %1 = vector.load %arg3[%c0_1, %c0_2] : memref<128x128xf32, #tpu.memory_space<vmem>>, vector<128x128xf32>
    %cst = arith.constant dense<0.000000e+00> : vector<8x128xf32>
    %2 = tpu.matmul %0, %1, %cst {dimension_numbers = #tpu.dot_dimension_numbers<[1], [0], [0], [1], [0, 0, 1, 1], [], []>, precision = #tpu.contract_precision<fp32>} : vector<8x128xf32>, vector<128x128xf32>, vector<8x128xf32> -> vector<8x128xf32>
    %c0_3 = arith.constant 0 : index
    %c0_4 = arith.constant 0 : index
    %3 = vector.load %arg4[%c0_3, %c0_4] : memref<1x128xf32, #tpu.memory_space<vmem>>, vector<1x128xf32>
    %4 = vector.broadcast %3 : vector<1x128xf32> to vector<8x128xf32>
    %5 = arith.addf %2, %4 : vector<8x128xf32>
    %c0_5 = arith.constant 0 : index
    %c0_6 = arith.constant 0 : index
    %6 = vector.load %arg5[%c0_5, %c0_6] : memref<8x128xf32, #tpu.memory_space<vmem>>, vector<8x128xf32>
    tpu.vector_store %arg5[%c0_5, %c0_6], %5 {strides = array<i32>} : memref<8x128xf32, #tpu.memory_space<vmem>>, vector<8x128xf32>,
    return
  }
  func.func @transform_0(%arg0: i32, %arg1: i32) -> (i32, i32) {
    %c0_i32 = arith.constant 0 : i32
    %c0_i32_0 = arith.constant 0 : i32
    return %arg0, %c0_i32 : i32, i32
  }
  func.func @transform_1(%arg0: i32, %arg1: i32) -> (i32, i32) {
    %c0_i32 = arith.constant 0 : i32
    %c0_i32_0 = arith.constant 0 : i32
    return %c0_i32, %arg1 : i32, i32
  }
  func.func @transform_2(%arg0: i32, %arg1: i32) -> (i32, i32) {
    %c0_i32 = arith.constant 0 : i32
    %c0_i32_0 = arith.constant 0 : i32
    return %c0_i32, %arg1 : i32, i32
  }
  func.func @transform_3(%arg0: i32, %arg1: i32) -> (i32, i32) {
    %c0_i32 = arith.constant 0 : i32
    return %arg0, %arg1 : i32, i32
  }
}

</mosaic_0001>

<bundles_post_ra>
// kernel: _linear_forward_2d.1
= control target key start
LH: loop header
LB: loop body
LE: loop exit
PB: predicated region body
PF: predicated region fallthrough
CT: control target
= control target key end

     0   :  { %8 = vsyncpa [#allocation3], 0  ;;  %s1258_s0 = inlined_call_operand.vmem [shape: f32[16,128], index: 0, kind: input, shape index: {}]   ;;  %s1259_s1 = inlined_call_operand.hbm [shape: f32[128,128], index: 1, kind: input, shape index: {}]   ;;  %s1260_s2 = inlined_call_operand.vmem [shape: f32[1,128], index: 2, kind: input, shape index: {}]   ;;  %s1261_s3 = inlined_call_operand.hbm [shape: f32[16,128], index: 3, kind: output, shape index: {}]  }
   0x1   :  { %9 = vsyncpa [#allocation4], 0 }
   0x2   :  { %11 = vsyncpa [#allocation4 + $0x1], 0  ;;  %s912_s12 = smov 0   ;;  %s914_s13 = smov 0  }
   0x3   :  { %s916_s14 = smov 0   ;;  %s918_s15 = smov 0  }
   0x4   :  { %s920_s16 = smov 0   ;;  %s922_s17 = smov 0  }
   0x5 LB: > { %s692_s18 = sadd.s32 4294967295, %s887_s17   ;;  %s693_s19 = sadd.s32 4294967294, %s887_s17   ;;  %s887_s17 = sphi %s922_s17, %s17_s17   ;;  %s883_s16 = sphi %s920_s16, %s1268_s16   ;;  %s879_s15 = sphi %s918_s15, %s1267_s15   ;;  %s875_s14 = sphi %s916_s14, %s1266_s14   ;;  %s871_s13 = sphi %s914_s13, %s1265_s13   ;;  %s867_s12 = sphi %s912_s12, %s1264_s12  }
   0x6   : > { %s29_s20 = sadd.s32 1, %s883_s16  ;;  %s116_s21 = sadd.s32 1, %s875_s14 }
   0x7   : > { %p31_p0 = scmp.ge.s32.totalorder %s29_s20, 2  ;;  %p126_p1 = scmp.ne.s32.totalorder %s875_s14, %s871_s13 }
   0x8   : > { %p127_p2 = scmp.eq.s32.totalorder %s692_s18, 1  ;;  %p132_p3 = scmp.ne.s32.totalorder %s871_s13, %s867_s12 }
   0x9   : > { %s1270_s20 = smov (%p31_p0, %s29_s20), 0  ;;  %p133_p5 = scmp.eq.s32.totalorder %s693_s19, 1 }
   0xa   : > { %p952_p4 = por %p127_p2, %p126_p1  ;;  %s111_s23 = ssub.s32 %s883_s16, %s1270_s20 }
   0xb   : > { %p694_p6 = scmp.ge.s32.totalorder %s887_s17, 1  ;;  %p114_p7 = scmp.eq.s32.totalorder %s111_s23, 0 }
   0xc   : > { %p959_p8 = por %p133_p5, %p132_p3  ;;  %p140_p9 = scmp.lt.s32.totalorder %s887_s17, 3 }
   0xd   : > { %s965_s25 = scalar_select %p114_p7, %s875_s14, %s116_s21  }
   0xe   : > { %p141_p10 = pnand %p694_p6, %p140_p9  ;;  %p720_p11 = scmp.eq.s32.totalorder %s692_s18, 0 }
   0xf   : > { %s153_s28 = sshll.u32 %s1259_s1, 4  ;;  %s889_s29 = smov [#allocation2]   ;;  %s154_s28 = int_to_ptr.hbm [resolvable:$true] %s153_s28 }
  0x10   : > { %p712_p12 = pneg %p141_p10  ;;  %s155_s30 = sshll.u32 %s889_s29, 4  ;;  %s156_s30 = int_to_ptr.vmem [resolvable:$true] %s155_s30 }
  0x11   : > { %s890_s4 = smov 128   ;;  %s891_s5 = smov 8  }
  0x12   : > { %p713_p13 = pnand %p720_p11, %p712_p12  ;;  %184 = sbr.rel (%p141_p10) target bundleno = 229 (0xe5), region = 32 }
  0x14   : > { %715 = dma.hbm_to_vmem [thread:$0]  (!%p713_p13), %s154_s28, 2048, %s156_s30, [#allocation3], %s890_s4, %s890_s4, %s891_s5  }
  0x17   : > { %858 = dma.done.wait (%p720_p11), [#allocation3], 2048  }
  0x18   : > { %860 = vsyncadd (%p720_p11), [#allocation3], 4294965248  ;;  %v234_v0 = vld [vmem:[#allocation2 + $0x78] sm:$0xff]  ;;  %v233_v1 = vld [vmem:[#allocation2 + $0x70] sm:$0xff]  ;;  %p211_p0 = scmp.lt.s32.totalorder %s879_s15, 1  ;;  %s208_s19 = sand.u32 1, %s871_s13  }
  0x19   : > { %v232_v2 = vld [vmem:[#allocation2 + $0x68] sm:$0xff]  ;;  %v970_v3 = vand.u32 4294901760, %v234_v0  ;;  %v972_v4 = vand.u32 4294901760, %v233_v1  ;;  %v231_v6 = vld [vmem:[#allocation2 + $0x60] sm:$0xff]  ;;  %v230_v7 = vld [vmem:[#allocation2 + $0x58] sm:$0xff]  ;;  %s700_s21 = sshll.u32 %s208_s19, 3 }
  0x1a   : > { %v974_v5 = vand.u32 4294901760, %v232_v2  ;;  %v229_v8 = vld [vmem:[#allocation2 + $0x50] sm:$0xff]  ;;  %v976_v9 = vand.u32 4294901760, %v231_v6  ;;  %v978_v10 = vand.u32 4294901760, %v230_v7  ;;  %v228_v12 = vld [vmem:[#allocation2 + $0x48] sm:$0xff]  ;;  %v227_v13 = vld [vmem:[#allocation2 + $0x40] sm:$0xff] }
  0x1b   : > { %v980_v11 = vand.u32 4294901760, %v229_v8  ;;  %240 = vmatpush.msra.mxu0 %v970_v3  ;;  %v984_v14 = vsub.f32 %v234_v0, %v970_v3  ;;  %v987_v15 = vsub.f32 %v233_v1, %v972_v4  ;;  %v992_v17 = vand.u32 4294901760, %v228_v12  ;;  %436 = vmatpush.msra.mxu3 %v970_v3  ;;  %v226_v21 = vld [vmem:[#allocation2 + $0x38] sm:$0xff]  ;;  %v225_v34 = vld [vmem:[#allocation2 + $0x30] sm:$0xff]  ;;  %v224_v35 = vld [vmem:[#allocation2 + $0x28] sm:$0xff]  ;;  %s1049_s6 = scalar_select %p211_p0, %s879_s15, 1 }
  0x1c   : > { %v990_v16 = vsub.f32 %v232_v2, %v974_v5  ;;  %v996_v18 = vsub.f32 %v231_v6, %v976_v9  ;;  %v999_v19 = vsub.f32 %v230_v7, %v978_v10  ;;  %v1001_v20 = vand.u32 4294901760, %v227_v13  ;;  %v223_v42 = vld [vmem:[#allocation2 + $0x20] sm:$0xff]  ;;  %v222_v47 = vld [vmem:[#allocation2 + $0x18] sm:$0xff]  ;;  %v221_v53 = vld [vmem:[#allocation2 + $0x10] sm:$0xff]  ;;  %s703_s23 = sshll.u32 %s879_s15, 3  ;;  %s210_s29 = scalar_lea.vmem [#allocation5], %s700_s21 }
  0x1d   : > { %242 = vmatpush.msra.mxu0 %v972_v4  ;;  %v282_v22 = vand.u32 4294901760, %v984_v14  ;;  %v288_v23 = vand.u32 4294901760, %v987_v15  ;;  %v1008_v25 = vsub.f32 %v229_v8, %v980_v11  ;;  %383 = vmatpush.msra.mxu2 %v984_v14  ;;  %v1014_v28 = vsub.f32 %v228_v12, %v992_v17  ;;  %s701_s7 = sshll.u32 %s1049_s6, 3  ;;  %v220_v61 = vld [vmem:[#allocation2 + $0x8] sm:$0xff]  ;;  %v219_v2 = vld [vmem:[#allocation2] sm:$0xff]  ;;  %s593_s28 = scalar_lea.hbm %s1261_s3, %s703_s23 }
  0x1e   : > { %v294_v24 = vand.u32 4294901760, %v990_v16  ;;  %v300_v26 = vand.u32 4294901760, %v996_v18  ;;  %v306_v27 = vand.u32 4294901760, %v999_v19  ;;  %438 = vmatpush.msra.mxu3 %v972_v4  ;;  %v1028_v32 = vand.u32 4294901760, %v226_v21  ;;  %s214_s10 = scalar_lea.vmem %s1258_s0, %s701_s7  ;;  %s595_s30 = sshll.u32 %s210_s29, 4  ;;  %s596_s30 = int_to_ptr.vmem [resolvable:$true] %s595_s30 }
  0x1f   : > { %v283_v29 = vsub.f32 %v984_v14, %v282_v22  ;;  %244 = vmatpush.msra.mxu0 %v974_v5  ;;  %v289_v30 = vsub.f32 %v987_v15, %v288_v23  ;;  %386 = vmatpush.msra.mxu2 %v987_v15  ;;  %v1032_v33 = vsub.f32 %v227_v13, %v1001_v20  ;;  %v312_v39 = vand.u32 4294901760, %v1008_v25  ;;  %s597_s4 = sshll.u32 %s593_s28, 4  ;;  %s582_s5 = scalar_lea.sflag [#allocation4], %s208_s19  ;;  %s598_s4 = int_to_ptr.hbm [resolvable:$true] %s597_s4 }
  0x20   : > { %v295_v31 = vsub.f32 %v990_v16, %v294_v24  ;;  %440 = vmatpush.msra.mxu3 %v974_v5  ;;  %v301_v38 = vsub.f32 %v996_v18, %v300_v26  ;;  %v307_v40 = vsub.f32 %v999_v19, %v306_v27  ;;  %v318_v41 = vand.u32 4294901760, %v1014_v28  ;;  %s819_s6 = sshra.s32 %s598_s4, 4  ;;  %s825_s9 = scalar_lea.hbm %s1261_s3, 16  ;;  %s820_s6 = int_to_ptr.hbm [resolvable:$true] %s819_s6 }
  0x21   : > { %v284_v36 = vand.u32 4294901760, %v283_v29  ;;  %v290_v37 = vand.u32 4294901760, %v289_v30  ;;  %246 = vmatpush.msra.mxu0 %v976_v9  ;;  %389 = vmatpush.msra.mxu2 %v990_v16  ;;  %v1052_v44 = vand.u32 4294901760, %v225_v34  ;;  %v1055_v45 = vsub.f32 %v226_v21, %v1028_v32  ;;  %v218_v29 = vld [vmem:[%s214_s10] sm:$0xff]  ;;  %s821_s15 = scalar_lea.hbm %s820_s6, 8  ;;  %p826_p5 = scmp.lt.s32.totalorder %s820_s6, %s1261_s3 }
  0x22   : > { %442 = vmatpush.msra.mxu3 %v976_v9  ;;  %v296_v43 = vand.u32 4294901760, %v295_v31  ;;  %v1057_v46 = vand.u32 4294901760, %v224_v35  ;;  %v324_v48 = vand.u32 4294901760, %v1032_v33  ;;  %v302_v49 = vand.u32 4294901760, %v301_v38  ;;  %p822_p1 = scmp.ne.s32.totalorder %s820_s6, %s821_s15  ;;  %p827_p6 = scmp.lt.s32.totalorder %s825_s9, %s821_s15 }
  0x23   : > { %285 = vmatpush.msra.mxu1 %v284_v36  ;;  %248 = vmatpush.msra.mxu0 %v978_v10  ;;  %v313_v50 = vsub.f32 %v1008_v25, %v312_v39  ;;  %v1067_v51 = vsub.f32 %v225_v34, %v1052_v44  ;;  %v1069_v52 = vand.u32 4294901760, %v223_v42  ;;  %v1071_v54 = vand.u32 4294901760, %v222_v47 }
  0x24   : > { %392 = vmatpush.msra.mxu2 %v996_v18  ;;  %444 = vmatpush.msra.mxu3 %v978_v10  ;;  %v308_v55 = vand.u32 4294901760, %v307_v40  ;;  %v319_v56 = vsub.f32 %v1014_v28, %v318_v41  ;;  %v330_v57 = vand.u32 4294901760, %v1055_v45  ;;  %v1082_v58 = vsub.f32 %v224_v35, %v1057_v46  ;;  %p823_p2 = pnand %p822_p1, %p952_p4  ;;  %p828_p7 = por %p827_p6, %p826_p5 }
  0x25   : > { %291 = vmatpush.msra.mxu1 %v290_v37  ;;  %250 = vmatpush.msra.mxu0 %v980_v11  ;;  %v325_v59 = vsub.f32 %v1032_v33, %v324_v48  ;;  %v1087_v60 = vand.u32 4294901760, %v221_v53  ;;  %v314_v62 = vand.u32 4294901760, %v313_v50  ;;  %v336_v63 = vand.u32 4294901760, %v1067_v51 }
  0x26   : > { %395 = vmatpush.msra.mxu2 %v999_v19  ;;  %446 = vmatpush.msra.mxu3 %v980_v11  ;;  %v1094_v0 = vsub.f32 %v223_v42, %v1069_v52  ;;  %v1100_v1 = vsub.f32 %v222_v47, %v1071_v54  ;;  %v320_v6 = vand.u32 4294901760, %v319_v56  ;;  %v331_v7 = vsub.f32 %v1055_v45, %v330_v57  ;;  %p824_p3 = pneg %p823_p2 }
  0x27   : > { %297 = vmatpush.msra.mxu1 %v296_v43  ;;  %252 = vmatpush.msra.mxu0 %v992_v17  ;;  %v342_v8 = vand.u32 4294901760, %v1082_v58  ;;  %v1109_v12 = vand.u32 4294901760, %v220_v61  ;;  %v326_v13 = vand.u32 4294901760, %v325_v59  ;;  %v1112_v21 = vsub.f32 %v221_v53, %v1087_v60 }
  0x28   : > { %398 = vmatpush.msra.mxu2 %v1008_v25  ;;  %448 = vmatpush.msra.mxu3 %v992_v17  ;;  %v337_v30 = vsub.f32 %v1067_v51, %v336_v63  ;;  %v348_v31 = vand.u32 4294901760, %v1094_v0  ;;  %v1121_v34 = vand.u32 4294901760, %v219_v2  ;;  %v1123_v35 = vand.u32 4294901760, %v218_v29  ;;  %p829_p9 = pnand %p828_p7, %p824_p3 }
  0x29   : > { %303 = vmatpush.msra.mxu1 %v302_v49  ;;  %254 = vmatpush.msra.mxu0 %v1001_v20  ;;  %v354_v36 = vand.u32 4294901760, %v1100_v1  ;;  %v332_v37 = vand.u32 4294901760, %v331_v7  ;;  %v343_v38 = vsub.f32 %v1082_v58, %v342_v8  ;;  %v1133_v40 = vsub.f32 %v220_v61, %v1109_v12 }
  0x2a   : > { %401 = vmatpush.msra.mxu2 %v1014_v28  ;;  %450 = vmatpush.msra.mxu3 %v1001_v20  ;;  %v272_v42 = vsub.f32 %v218_v29, %v1123_v35  ;;  %v338_v43 = vand.u32 4294901760, %v337_v30  ;;  %v349_v47 = vsub.f32 %v1094_v0, %v348_v31  ;;  %v360_v49 = vand.u32 4294901760, %v1112_v21 }
  0x2b   : > { %309 = vmatpush.msra.mxu1 %v308_v55  ;;  %256 = vmatpush.msra.mxu0 %v1028_v32  ;;  %v1144_v50 = vsub.f32 %v219_v2, %v1121_v34  ;;  %v344_v53 = vand.u32 4294901760, %v343_v38  ;;  %v355_v55 = vsub.f32 %v1100_v1, %v354_v36  ;;  %v366_v56 = vand.u32 4294901760, %v1133_v40 }
  0x2c   : > { %404 = vmatpush.msra.mxu2 %v1032_v33  ;;  %452 = vmatpush.msra.mxu3 %v1028_v32  ;;  %v273_v59 = vand.u32 4294901760, %v272_v42  ;;  %v350_v61 = vand.u32 4294901760, %v349_v47 }
  0x2d   : > { %315 = vmatpush.msra.mxu1 %v314_v62  ;;  %258 = vmatpush.msra.mxu0 %v1052_v44  ;;  %v361_v62 = vsub.f32 %v1112_v21, %v360_v49  ;;  %v372_v2 = vand.u32 4294901760, %v1144_v50  ;;  %v367_v7 = vsub.f32 %v1133_v40, %v366_v56 }
  0x2e   : > { %407 = vmatpush.msra.mxu2 %v1055_v45  ;;  %454 = vmatpush.msra.mxu3 %v1052_v44 }
  0x2f   : > { %321 = vmatpush.msra.mxu1 %v320_v6  ;;  %260 = vmatpush.msra.mxu0 %v1057_v46  ;;  %v356_v6 = vand.u32 4294901760, %v355_v55  ;;  %v362_v29 = vand.u32 4294901760, %v361_v62  ;;  %v373_v30 = vsub.f32 %v1144_v50, %v372_v2 }
  0x30   : > { %410 = vmatpush.msra.mxu2 %v1067_v51  ;;  %456 = vmatpush.msra.mxu3 %v1057_v46 }
  0x31   : > { %327 = vmatpush.msra.mxu1 %v326_v13  ;;  %262 = vmatpush.msra.mxu0 %v1069_v52  ;;  %v274_v13 = vsub.f32 %v272_v42, %v273_v59 }
  0x32   : > { %413 = vmatpush.msra.mxu2 %v1082_v58  ;;  %458 = vmatpush.msra.mxu3 %v1069_v52 }
  0x33   : > { %333 = vmatpush.msra.mxu1 %v332_v37  ;;  %264 = vmatpush.msra.mxu0 %v1071_v54  ;;  %v368_v37 = vand.u32 4294901760, %v367_v7  ;;  %v275_v38 = vand.u32 4294901760, %v274_v13 }
  0x34   : > { %416 = vmatpush.msra.mxu2 %v1094_v0  ;;  %460 = vmatpush.msra.mxu3 %v1071_v54 }
  0x35   : > { %339 = vmatpush.msra.mxu1 %v338_v43  ;;  %266 = vmatpush.msra.mxu0 %v1087_v60  ;;  %v374_v43 = vand.u32 4294901760, %v373_v30 }
  0x36   : > { %419 = vmatpush.msra.mxu2 %v1100_v1  ;;  %462 = vmatpush.msra.mxu3 %v1087_v60 }
  0x37   : > { %345 = vmatpush.msra.mxu1 %v344_v53  ;;  %268 = vmatpush.msra.mxu0 %v1109_v12 }
  0x38   : > { %422 = vmatpush.msra.mxu2 %v1112_v21  ;;  %464 = vmatpush.msra.mxu3 %v1109_v12 }
  0x39   : > { %351 = vmatpush.msra.mxu1 %v350_v61  ;;  %270 = vmatpush.msra.mxu0 %v1121_v34 }
  0x3a   : > { %425 = vmatpush.msra.mxu2 %v1133_v40  ;;  %466 = vmatpush.msra.mxu3 %v1121_v34 }
  0x3b   : > { %477 = vmatpush.msrb.mxu0 %v282_v22  ;;  %357 = vmatpush.msra.mxu1 %v356_v6 }
  0x3c   : > { %428 = vmatpush.msra.mxu2 %v1144_v50  ;;  %470 = vmatmul.f32.vlgmr.msra.gmra.mxu3 %v273_v59 }
  0x3d   : > { %481 = vmatpush.msrb.mxu0 %v288_v23  ;;  %363 = vmatpush.msra.mxu1 %v362_v29 }
  0x3e   : > { %431 = vmatmul.f32.vlgmr.msra.gmra.mxu2 %v272_v42  ;;  %276 = vmatmul.f32.vlgmr.msra.gmra.mxu0 %v275_v38 }
  0x3f   : > { %485 = vmatpush.msrb.mxu0 %v294_v24  ;;  %369 = vmatpush.msra.mxu1 %v368_v37 }
  0x41   : > { %489 = vmatpush.msrb.mxu0 %v300_v26  ;;  %375 = vmatpush.msra.mxu1 %v374_v43 }
  0x42   : > { %377 = vmatmul.f32.vlgmr.msra.gmra.mxu1 %v1123_v35 }
  0x43   : > { %544 = vmatpush.msrb.mxu1 %v970_v3  ;;  %493 = vmatpush.msrb.mxu0 %v306_v27  ;;  %v774_v3 = vld [vmem:[%s1260_s2] ss:$0 sm:$0xff] }
  0x45   : > { %546 = vmatpush.msrb.mxu1 %v972_v4  ;;  %497 = vmatpush.msrb.mxu0 %v312_v39 }
  0x47   : > { %548 = vmatpush.msrb.mxu1 %v974_v5  ;;  %501 = vmatpush.msrb.mxu0 %v318_v41 }
  0x49   : > { %550 = vmatpush.msrb.mxu1 %v976_v9  ;;  %505 = vmatpush.msrb.mxu0 %v324_v48 }
  0x4b   : > { %552 = vmatpush.msrb.mxu1 %v978_v10  ;;  %509 = vmatpush.msrb.mxu0 %v330_v57 }
  0x4d   : > { %554 = vmatpush.msrb.mxu1 %v980_v11  ;;  %513 = vmatpush.msrb.mxu0 %v336_v63 }
  0x4f   : > { %556 = vmatpush.msrb.mxu1 %v992_v17  ;;  %517 = vmatpush.msrb.mxu0 %v342_v8 }
  0x51   : > { %558 = vmatpush.msrb.mxu1 %v1001_v20  ;;  %521 = vmatpush.msrb.mxu0 %v348_v31 }
  0x53   : > { %560 = vmatpush.msrb.mxu1 %v1028_v32  ;;  %525 = vmatpush.msrb.mxu0 %v354_v36 }
  0x55   : > { %562 = vmatpush.msrb.mxu1 %v1052_v44  ;;  %529 = vmatpush.msrb.mxu0 %v360_v49 }
  0x57   : > { %564 = vmatpush.msrb.mxu1 %v1057_v46  ;;  %533 = vmatpush.msrb.mxu0 %v366_v56 }
  0x59   : > { %566 = vmatpush.msrb.mxu1 %v1069_v52  ;;  %537 = vmatpush.msrb.mxu0 %v372_v2 }
  0x5a   : > { %539 = vmatmul.f32.vlgmr.msrb.gmra.mxu0 %v1123_v35 }
  0x5b   : > { %568 = vmatpush.msrb.mxu1 %v1071_v54 }
  0x5d   : > { %570 = vmatpush.msrb.mxu1 %v1087_v60 }
  0x5f   : > { %572 = vmatpush.msrb.mxu1 %v1109_v12 }
  0x61   : > { %574 = vmatpush.msrb.mxu1 %v1121_v34 }
  0x62   : > { %576 = vmatmul.f32.vlgmr.msrb.gmra.mxu1 %v1123_v35 }
  0xbb   : > { %v277_v4 = vpop.f32.mrf.mxu0 }
  0xbc   : > { %v278_v5 = vadd.f32 %v774_v3, %v277_v4 }
  0xbf   : > { %v378_v9 = vpop.f32.mrf.mxu1  ;;  %v471_v15 = vpop.f32.mrf.mxu3 }
  0xc0   : > { %v379_v10 = vadd.f32 %v378_v9, %v278_v5 }
  0xc1   : > { %v432_v11 = vpop.f32.mrf.mxu2 }
  0xc2   : > { %v433_v14 = vadd.f32 %v432_v11, %v379_v10 }
  0xc4   : > { %v472_v16 = vadd.f32 %v471_v15, %v433_v14 }
  0xd7   : > { %v540_v17 = vpop.f32.mrf.mxu0 }
  0xd8   : > { %v541_v18 = vadd.f32 %v540_v17, %v472_v16 }
  0xdf   : > { %v577_v19 = vpop.f32.mrf.mxu1 }
  0xe0   : > { %v578_v20 = vadd.f32 %v577_v19, %v541_v18 }
  0xe2   : > { %580 = vst [vmem:[%s210_s29] sm:$0xff] %v578_v20 }
  0xe3   : > { %832 = shalt.err (!%p829_p9)
}
  0xe4   : > { %710 = dma.vmem_to_hbm [thread:$0]  (%p952_p4), %s596_s30, 128, %s598_s4, %s582_s5  }
  0xe5 PF: > { %p722_p10 = scmp.ge.s32.totalorder %s887_s17, 2  ;;  %s609_s18 = sand.u32 1, %s867_s12  }
  0xe6   : > { %s610_s19 = scalar_lea.sflag [#allocation4], %s609_s18 }
  0xe7   : > { %p717_p11 = pnand %p722_p10, %p959_p8 }
  0xe9   : > { %p718_p12 = pneg %p717_p11 }
  0xeb   : > { %862 = dma.done.wait (%p718_p12), %s610_s19, 128  }
  0xec   : > { %864 = vsyncadd (%p718_p12), %s610_s19, 4294967168  ;;  %s17_s17 = sadd.s32 1, %s887_s17   ;;  %s1264_s12 = smov %s871_s13 }
  0xed   : > { %p14_p13 = scmp.ge.s32.totalorder %s17_s17, 4   ;;  %s1265_s13 = smov %s875_s14 }
  0xee   : > { %s1266_s14 = smov %s965_s25  ;;  %s1267_s15 = smov %s883_s16 }
  0xef   : > { %s1268_s16 = smov %s1270_s20  ;;  %16 = sbr.rel (!%p14_p13) target bundleno = 5 (0x5), region = 76 }
  0xf4   :  { %616 = vsyncpa [#allocation3], 1 }
  0xf5   :  { %618 = vsyncpa [#allocation3 + $0x1], 1 }
  0xf6   :  { %619 = vsyncpa [#allocation4], 1 }
  0xf7   :  { %621 = vsyncpa [#allocation4 + $0x1], 1 }

</bundles_post_ra>
